<compile_context>
chip_gen: v6e
topology: v6e:2x2x1
jax: 0.10.0
libtpu: 0.0.40
codegen_flags: <defaults>
</compile_context>

<pallas_src>
import functools
import math

import jax
import jax.numpy as jnp
from jax import lax
from jax.experimental import pallas as pl
from jax.experimental.pallas import tpu as pltpu

# Conservative for v7x's 64 MiB/TC; can be raised toward 64-96 MiB on v5e/v6e.
_VMEM_LIMIT = 32 * 1024 * 1024


def _pick_tile(dim, target, align):
    """Largest tile <= target that divides `dim` and is a multiple of `align`;
    falls back to the full dim (always a legal block) if no such tile exists."""
    if dim <= target:
        return dim
    for t in range(target, align - 1, -1):
        if dim % t == 0 and t % align == 0:
            return t
    return dim


def _pick_head_block(num_heads, head_dim, target_cols):
    """Largest divisor of num_heads with head_block*head_dim <= target_cols."""
    best = 1
    for hb in range(1, num_heads + 1):
        if num_heads % hb == 0 and hb * head_dim <= max(target_cols, head_dim):
            best = hb
    return best


# ------------------- kernel 1: head-packed QKV projection --------------------
def _qkv_proj_kernel(x_ref, w_ref, o_ref, acc_ref, *, head_block, head_dim):
    kk = pl.program_id(3)

    @pl.when(kk == 0)
    def _():
        acc_ref[...] = jnp.zeros_like(acc_ref)

    # (TM, TKK) @ (TKK, HB*F): lane-dense N, f32 accumulation on the MXU.
    acc_ref[...] += jnp.dot(x_ref[...], w_ref[...],
                            preferred_element_type=jnp.float32)

    @pl.when(kk == pl.num_programs(3) - 1)
    def _():
        acc = acc_ref[...].astype(o_ref.dtype)            # (TM, HB*F)
        for b in range(head_block):                       # static unroll, epilogue only
            o_ref[b, :, :] = acc[:, b * head_dim:(b + 1) * head_dim]


# --------- kernel 2: fused flash attention + output projection + bias --------
def _flash_proj_kernel(q_ref, k_ref, v_ref, wp_ref, b_ref, y_ref,
                       m_sc, l_sc, o_acc, y_acc, *, scale, approx_recip):
    h = pl.program_id(1)
    kv = pl.program_id(2)

    @pl.when((h == 0) & (kv == 0))
    def _():
        y_acc[...] = jnp.zeros_like(y_acc)

    @pl.when(kv == 0)
    def _():
        m_sc[...] = jnp.full_like(m_sc, -jnp.inf)
        l_sc[...] = jnp.zeros_like(l_sc)
        o_acc[...] = jnp.zeros_like(o_acc)

    # Scores for this (q-tile, kv-tile): (TQ, TK), f32 accumulation on the MXU.
    # TODO(synk): small head dim F underfills the MXU contraction for QK^T / PV;
    #             packing several heads per matmul would raise MXU utilisation.
    # TODO(synk): if a bundle dump shows a vxpose for K, store K pre-transposed
    #             (H, F, C) at projection time (vxpose shares slots with vmatmul).
    s = lax.dot_general(q_ref[...], k_ref[...],
                        (((1,), (1,)), ((), ())),
                        preferred_element_type=jnp.float32) * scale

    m_prev = m_sc[...]
    m_new = jnp.maximum(m_prev, jnp.max(s, axis=-1, keepdims=True))
    alpha = jnp.exp(m_prev - m_new)
    p = jnp.exp(s - m_new)

    l_sc[...] = alpha * l_sc[...] + jnp.sum(p, axis=-1, keepdims=True)
    o_acc[...] = alpha * o_acc[...] + jnp.dot(
        p.astype(v_ref.dtype), v_ref[...], preferred_element_type=jnp.float32)
    m_sc[...] = m_new

    # Per-head epilogue: normalize and fold this head straight into the projection.
    @pl.when(kv == pl.num_programs(2) - 1)
    def _():
        if approx_recip:
            inv_l = pl.reciprocal(l_sc[...], approx=True)
        else:
            inv_l = 1.0 / l_sc[...]
        out_h = (o_acc[...] * inv_l).astype(wp_ref.dtype)            # (TQ, F)
        y_acc[...] += jnp.dot(out_h, wp_ref[...],
                              preferred_element_type=jnp.float32)    # (TQ, G)

    @pl.when((h == pl.num_programs(1) - 1) & (kv == pl.num_programs(2) - 1))
    def _():
        y_ref[...] = (y_acc[...] + b_ref[...]).astype(y_ref.dtype)


def attention2_pallas(x, w_qkv, w_proj, b_proj, *, num_heads,
                      compute_dtype=jnp.bfloat16,
                      tq=512, tk=512, tm=256, tkk=512,
                      head_block_cols=512,
                      vmem_limit_bytes=_VMEM_LIMIT):
    """x: (C, G); w_qkv: (3G, G) torch layout; w_proj: (G, G) torch layout; b_proj: (G,).

    compute_dtype is the dtype fed to the MXU (accumulation is always f32). The
    default bf16 is MXU-native on v5e/v6e/v7x and halves HBM/VMEM traffic; pass
    jnp.float32 (or None -> x.dtype) to keep full input precision.
    """
    C, G = x.shape
    H = num_heads
    assert G % H == 0, "dim must be divisible by num_heads"
    F = G // H
    scale = F ** (-0.5)

    x = jnp.asarray(x)
    out_dtype = x.dtype
    cdt = jnp.dtype(x.dtype if compute_dtype is None else compute_dtype)

    # ---- one-time wrapper-side weight layout transforms (not in the hot path) ----
    HB = _pick_head_block(H, F, head_block_cols)     # heads packed per kernel-1 step
    NHB = H // HB
    HBF = HB * F
    # w_packed[n, g] : (G, HB*F) so x @ w_packed[n, g] = heads [g*HB, (g+1)*HB) of {q,k,v}.
    w_packed = (jnp.asarray(w_qkv).reshape(3, NHB, HB, F, G)
                .transpose(0, 1, 4, 2, 3).reshape(3, NHB, G, HBF).astype(cdt))
    # wproj_hm[h] : (F, G) slice of Wproj^T acting on head h's features.
    wproj_hm = jnp.asarray(w_proj).T.reshape(H, F, G).astype(cdt)
    bias2d = jnp.asarray(b_proj).reshape(1, G).astype(jnp.float32)
    x_c = x.astype(cdt)

    # ---- tile sizes (dtype-aware sublane alignment; full dims are always legal) ----
    sub = max(8, 32 // cdt.itemsize)   # 8 for f32, 16 for bf16, 32 for int8/fp8
    TM = _pick_tile(C, tm, sub)        # projection row tile
    TKK = _pick_tile(G, tkk, 128)      # qkv contraction tile
    TQ = _pick_tile(C, tq, sub)        # flash query-row tile
    TK = _pick_tile(C, tk, sub)        # flash kv-row tile

    # Guard the full-dim fallback: the (TQ, TK) f32 score temp must fit comfortably.
    assert TQ * TK * 4 <= vmem_limit_bytes // 4, (
        "flash score tile too large; pad C to a tileable size or lower tq/tk")

    # ---------------- 1) head-packed QKV projection -> (3, H, C, F) --------------
    qkv_hm = pl.pallas_call(
        functools.partial(_qkv_proj_kernel, head_block=HB, head_dim=F),
        out_shape=jax.ShapeDtypeStruct((3, H, C, F), cdt),
        grid=(3, NHB, C // TM, G // TKK),
        in_specs=[
            pl.BlockSpec((TM, TKK), lambda n, g, i, kk: (i, kk)),
            pl.BlockSpec((None, None, TKK, HBF), lambda n, g, i, kk: (n, g, kk, 0)),
        ],
        out_specs=pl.BlockSpec((None, HB, TM, F), lambda n, g, i, kk: (n, g, i, 0)),
        scratch_shapes=[pltpu.VMEM((TM, HBF), jnp.float32)],
        compiler_params=pltpu.CompilerParams(
            dimension_semantics=("parallel", "parallel", "parallel", "arbitrary"),
            vmem_limit_bytes=vmem_limit_bytes),
    )(x_c, w_packed)

    # -------- 2) fused flash attention + output projection + bias -> (C, G) ------
    y = pl.pallas_call(
        functools.partial(_flash_proj_kernel, scale=scale,
                          approx_recip=bool(cdt.itemsize < 4)),
        out_shape=jax.ShapeDtypeStruct((C, G), out_dtype),
        grid=(C // TQ, H, C // TK),
        in_specs=[
            pl.BlockSpec((None, None, TQ, F), lambda qi, h, kv: (0, h, qi, 0)),  # q
            pl.BlockSpec((None, None, TK, F), lambda qi, h, kv: (1, h, kv, 0)),  # k
            pl.BlockSpec((None, None, TK, F), lambda qi, h, kv: (2, h, kv, 0)),  # v
            pl.BlockSpec((None, F, G), lambda qi, h, kv: (h, 0, 0)),             # Wproj_h
            pl.BlockSpec((1, G), lambda qi, h, kv: (0, 0)),                      # bias
        ],
        out_specs=pl.BlockSpec((TQ, G), lambda qi, h, kv: (qi, 0)),
        scratch_shapes=[pltpu.VMEM((TQ, 1), jnp.float32),    # running max
                        pltpu.VMEM((TQ, 1), jnp.float32),    # running sum
                        pltpu.VMEM((TQ, F), jnp.float32),    # per-head f32 acc
                        pltpu.VMEM((TQ, G), jnp.float32)],   # projected-output f32 acc
        compiler_params=pltpu.CompilerParams(
            dimension_semantics=("parallel", "arbitrary", "arbitrary"),
            vmem_limit_bytes=vmem_limit_bytes),
    )(qkv_hm, qkv_hm, qkv_hm, wproj_hm, bias2d)

    return y


def attention2_ref(x, w_qkv, w_proj, b_proj, *, num_heads):
    """Pure-JAX reference matching the PyTorch forward (high-precision matmuls)."""
    C, G = x.shape
    H = num_heads
    F = G // H
    scale = F ** (-0.5)
    hp = lax.Precision.HIGHEST
    qkv = jnp.dot(x, w_qkv.T, precision=hp)              # (C, 3G)
    qkv = qkv.reshape(C, 3, H, F).transpose(1, 2, 0, 3)  # (3, H, C, F)
    q, k, v = qkv[0], qkv[1], qkv[2]
    attn = jnp.einsum('hcf,hkf->hck', q, k, precision=hp) * scale
    attn = jax.nn.softmax(attn, axis=-1)
    out = jnp.einsum('hck,hkf->hcf', attn, v, precision=hp)
    out = out.transpose(1, 0, 2).reshape(C, G)
    return jnp.dot(out, w_proj.T, precision=hp) + b_proj


if __name__ == "__main__":
    configs = [
        # toy shape: every block is the full array
        dict(C=8, G=32, H=8, kw=dict()),
        # multi-tile online softmax, K-reduction and head accumulation
        dict(C=64, G=256, H=8, kw=dict(tq=32, tk=32, tm=32, tkk=128)),
        # same, but with multiple head-blocks in the QKV projection (NHB > 1)
        dict(C=64, G=256, H=8, kw=dict(tq=32, tk=32, tm=32, tkk=128,
                                       head_block_cols=128)),
    ]
    for cfg in configs:
        C, G, H = cfg["C"], cfg["G"], cfg["H"]
        key = jax.random.PRNGKey(0)
        k_x, k_qkv, k_proj, k_b = jax.random.split(key, 4)

        x = jax.random.normal(k_x, (C, G), dtype=jnp.float32)
        w_qkv = jax.random.normal(k_qkv, (3 * G, G), dtype=jnp.float32) / math.sqrt(G)
        w_proj = jax.random.normal(k_proj, (G, G), dtype=jnp.float32) / math.sqrt(G)
        b_proj = jax.random.normal(k_b, (G,), dtype=jnp.float32) * 0.01

        y_ref = attention2_ref(x, w_qkv, w_proj, b_proj, num_heads=H)

        # Full-precision MXU path: tight check of the algorithm.
        y32 = attention2_pallas(x, w_qkv, w_proj, b_proj, num_heads=H,
                                compute_dtype=jnp.float32, **cfg["kw"])
        y32 = jax.block_until_ready(y32)
        d32 = float(jnp.max(jnp.abs(y32 - y_ref)))
        assert jnp.allclose(y32, y_ref, atol=5e-3, rtol=5e-3), (
            f"f32 mismatch at C={C} G={G} H={H}: max abs diff {d32}")

        # bf16-operand path (production default): tolerance consistent with bf16
        # operand rounding (accumulation stays f32 inside the kernels).
        ybf = attention2_pallas(x, w_qkv, w_proj, b_proj, num_heads=H,
                                compute_dtype=jnp.bfloat16, **cfg["kw"])
        ybf = jax.block_until_ready(ybf)
        dbf = float(jnp.max(jnp.abs(ybf.astype(jnp.float32) - y_ref)))
        lim = 0.1 * float(jnp.max(jnp.abs(y_ref))) + 0.05
        assert dbf <= lim, (
            f"bf16 mismatch at C={C} G={G} H={H}: max abs diff {dbf} > {lim}")

    print("KERNEL_OK")
</pallas_src>

<mosaic_0001>
module attributes {stable_mosaic.version = 11 : i64} {
  func.func @_qkv_proj_kernel(%arg0: i32, %arg1: i32, %arg2: i32, %arg3: i32, %arg4: memref<8x32xf32, #tpu.memory_space<vmem>>, %arg5: memref<1x1x32x32xf32, #tpu.memory_space<vmem>>, %arg6: memref<1x8x8x4xf32, #tpu.memory_space<vmem>>, %arg7: memref<8x32xf32, #tpu.memory_space<vmem>>) attributes {dimension_semantics = [#tpu.dimension_semantics<parallel>, #tpu.dimension_semantics<parallel>, #tpu.dimension_semantics<parallel>, #tpu.dimension_semantics<arbitrary>], iteration_bounds = array<i64: 3, 1, 1, 1>, scalar_prefetch = 0 : i64, scratch_operands = 1 : i64, tpu.core_type = #tpu.core_type<tc>, window_params = [{transform_indices = @transform_0, window_bounds = array<i64: 8, 32>}, {transform_indices = @transform_1, window_bounds = array<i64: 1, 1, 32, 32>}, {transform_indices = @transform_2, window_bounds = array<i64: 1, 8, 8, 4>}]} {
    %c0_i32 = arith.constant 0 : i32
    %0 = arith.cmpi eq, %arg3, %c0_i32 : i32
    %1 = arith.extui %0 : i1 to i32
    %c0_i32_0 = arith.constant 0 : i32
    %2 = arith.cmpi ne, %1, %c0_i32_0 : i32
    scf.if %2 {
      %cst_12 = arith.constant 0.000000e+00 : f32
      %13 = vector.broadcast %cst_12 : f32 to vector<8x32xf32>
      %c0_13 = arith.constant 0 : index
      %c0_14 = arith.constant 0 : index
      %14 = vector.load %arg7[%c0_13, %c0_14] : memref<8x32xf32, #tpu.memory_space<vmem>>, vector<8x32xf32>
      tpu.vector_store %arg7[%c0_13, %c0_14], %13 {strides = array<i32>} : memref<8x32xf32, #tpu.memory_space<vmem>>, vector<8x32xf32>,
    } else {
    }
    %c0 = arith.constant 0 : index
    %c0_1 = arith.constant 0 : index
    %3 = vector.load %arg7[%c0, %c0_1] : memref<8x32xf32, #tpu.memory_space<vmem>>, vector<8x32xf32>
    %c0_2 = arith.constant 0 : index
    %c0_3 = arith.constant 0 : index
    %4 = vector.load %arg4[%c0_2, %c0_3] : memref<8x32xf32, #tpu.memory_space<vmem>>, vector<8x32xf32>
    %c0_4 = arith.constant 0 : index
    %c0_5 = arith.constant 0 : index
    %c0_6 = arith.constant 0 : index
    %c0_7 = arith.constant 0 : index
    %5 = vector.load %arg5[%c0_4, %c0_5, %c0_6, %c0_7] : memref<1x1x32x32xf32, #tpu.memory_space<vmem>>, vector<1x1x32x32xf32>
    %6 = vector.shape_cast %5 : vector<1x1x32x32xf32> to vector<32x32xf32>
    %cst = arith.constant dense<0.000000e+00> : vector<8x32xf32>
    %7 = tpu.matmul %4, %6, %cst {dimension_numbers = #tpu.dot_dimension_numbers<[1], [0], [0], [1], [0, 0, 1, 1], [], []>} : vector<8x32xf32>, vector<32x32xf32>, vector<8x32xf32> -> vector<8x32xf32>
    %8 = arith.addf %3, %7 : vector<8x32xf32>
    %c0_8 = arith.constant 0 : index
    %c0_9 = arith.constant 0 : index
    %9 = vector.load %arg7[%c0_8, %c0_9] : memref<8x32xf32, #tpu.memory_space<vmem>>, vector<8x32xf32>
    tpu.vector_store %arg7[%c0_8, %c0_9], %8 {strides = array<i32>} : memref<8x32xf32, #tpu.memory_space<vmem>>, vector<8x32xf32>,
    %c0_i32_10 = arith.constant 0 : i32
    %10 = arith.cmpi eq, %arg3, %c0_i32_10 : i32
    %11 = arith.extui %10 : i1 to i32
    %c0_i32_11 = arith.constant 0 : i32
    %12 = arith.cmpi ne, %11, %c0_i32_11 : i32
    scf.if %12 {
      %c0_12 = arith.constant 0 : index
      %c0_13 = arith.constant 0 : index
      %13 = vector.load %arg7[%c0_12, %c0_13] : memref<8x32xf32, #tpu.memory_space<vmem>>, vector<8x32xf32>
      %14 = vector.extract_strided_slice %13 {offsets = [0, 0], sizes = [8, 4], strides = [1, 1]} : vector<8x32xf32> to vector<8x4xf32>
      %c0_14 = arith.constant 0 : index
      %c0_15 = arith.constant 0 : index
      %c0_16 = arith.constant 0 : index
      %c0_17 = arith.constant 0 : index
      %15 = vector.load %arg6[%c0_14, %c0_15, %c0_16, %c0_17] : memref<1x8x8x4xf32, #tpu.memory_space<vmem>>, vector<1x1x8x4xf32>
      %16 = vector.shape_cast %15 : vector<1x1x8x4xf32> to vector<8x4xf32>
      %17 = vector.shape_cast %14 : vector<8x4xf32> to vector<1x1x8x4xf32>
      tpu.vector_store %arg6[%c0_14, %c0_15, %c0_16, %c0_17], %17 {strides = array<i32>} : memref<1x8x8x4xf32, #tpu.memory_space<vmem>>, vector<1x1x8x4xf32>,
      %18 = vector.extract_strided_slice %13 {offsets = [0, 4], sizes = [8, 4], strides = [1, 1]} : vector<8x32xf32> to vector<8x4xf32>
      %c0_18 = arith.constant 0 : index
      %c1 = arith.constant 1 : index
      %c0_19 = arith.constant 0 : index
      %c0_20 = arith.constant 0 : index
      %19 = vector.load %arg6[%c0_18, %c1, %c0_19, %c0_20] : memref<1x8x8x4xf32, #tpu.memory_space<vmem>>, vector<1x1x8x4xf32>
      %20 = vector.shape_cast %19 : vector<1x1x8x4xf32> to vector<8x4xf32>
      %21 = vector.shape_cast %18 : vector<8x4xf32> to vector<1x1x8x4xf32>
      tpu.vector_store %arg6[%c0_18, %c1, %c0_19, %c0_20], %21 {strides = array<i32>} : memref<1x8x8x4xf32, #tpu.memory_space<vmem>>, vector<1x1x8x4xf32>,
      %22 = vector.extract_strided_slice %13 {offsets = [0, 8], sizes = [8, 4], strides = [1, 1]} : vector<8x32xf32> to vector<8x4xf32>
      %c0_21 = arith.constant 0 : index
      %c2 = arith.constant 2 : index
      %c0_22 = arith.constant 0 : index
      %c0_23 = arith.constant 0 : index
      %23 = vector.load %arg6[%c0_21, %c2, %c0_22, %c0_23] : memref<1x8x8x4xf32, #tpu.memory_space<vmem>>, vector<1x1x8x4xf32>
      %24 = vector.shape_cast %23 : vector<1x1x8x4xf32> to vector<8x4xf32>
      %25 = vector.shape_cast %22 : vector<8x4xf32> to vector<1x1x8x4xf32>
      tpu.vector_store %arg6[%c0_21, %c2, %c0_22, %c0_23], %25 {strides = array<i32>} : memref<1x8x8x4xf32, #tpu.memory_space<vmem>>, vector<1x1x8x4xf32>,
      %26 = vector.extract_strided_slice %13 {offsets = [0, 12], sizes = [8, 4], strides = [1, 1]} : vector<8x32xf32> to vector<8x4xf32>
      %c0_24 = arith.constant 0 : index
      %c3 = arith.constant 3 : index
      %c0_25 = arith.constant 0 : index
      %c0_26 = arith.constant 0 : index
      %27 = vector.load %arg6[%c0_24, %c3, %c0_25, %c0_26] : memref<1x8x8x4xf32, #tpu.memory_space<vmem>>, vector<1x1x8x4xf32>
      %28 = vector.shape_cast %27 : vector<1x1x8x4xf32> to vector<8x4xf32>
      %29 = vector.shape_cast %26 : vector<8x4xf32> to vector<1x1x8x4xf32>
      tpu.vector_store %arg6[%c0_24, %c3, %c0_25, %c0_26], %29 {strides = array<i32>} : memref<1x8x8x4xf32, #tpu.memory_space<vmem>>, vector<1x1x8x4xf32>,
      %30 = vector.extract_strided_slice %13 {offsets = [0, 16], sizes = [8, 4], strides = [1, 1]} : vector<8x32xf32> to vector<8x4xf32>
      %c0_27 = arith.constant 0 : index
      %c4 = arith.constant 4 : index
      %c0_28 = arith.constant 0 : index
      %c0_29 = arith.constant 0 : index
      %31 = vector.load %arg6[%c0_27, %c4, %c0_28, %c0_29] : memref<1x8x8x4xf32, #tpu.memory_space<vmem>>, vector<1x1x8x4xf32>
      %32 = vector.shape_cast %31 : vector<1x1x8x4xf32> to vector<8x4xf32>
      %33 = vector.shape_cast %30 : vector<8x4xf32> to vector<1x1x8x4xf32>
      tpu.vector_store %arg6[%c0_27, %c4, %c0_28, %c0_29], %33 {strides = array<i32>} : memref<1x8x8x4xf32, #tpu.memory_space<vmem>>, vector<1x1x8x4xf32>,
      %34 = vector.extract_strided_slice %13 {offsets = [0, 20], sizes = [8, 4], strides = [1, 1]} : vector<8x32xf32> to vector<8x4xf32>
      %c0_30 = arith.constant 0 : index
      %c5 = arith.constant 5 : index
      %c0_31 = arith.constant 0 : index
      %c0_32 = arith.constant 0 : index
      %35 = vector.load %arg6[%c0_30, %c5, %c0_31, %c0_32] : memref<1x8x8x4xf32, #tpu.memory_space<vmem>>, vector<1x1x8x4xf32>
      %36 = vector.shape_cast %35 : vector<1x1x8x4xf32> to vector<8x4xf32>
      %37 = vector.shape_cast %34 : vector<8x4xf32> to vector<1x1x8x4xf32>
      tpu.vector_store %arg6[%c0_30, %c5, %c0_31, %c0_32], %37 {strides = array<i32>} : memref<1x8x8x4xf32, #tpu.memory_space<vmem>>, vector<1x1x8x4xf32>,
      %38 = vector.extract_strided_slice %13 {offsets = [0, 24], sizes = [8, 4], strides = [1, 1]} : vector<8x32xf32> to vector<8x4xf32>
      %c0_33 = arith.constant 0 : index
      %c6 = arith.constant 6 : index
      %c0_34 = arith.constant 0 : index
      %c0_35 = arith.constant 0 : index
      %39 = vector.load %arg6[%c0_33, %c6, %c0_34, %c0_35] : memref<1x8x8x4xf32, #tpu.memory_space<vmem>>, vector<1x1x8x4xf32>
      %40 = vector.shape_cast %39 : vector<1x1x8x4xf32> to vector<8x4xf32>
      %41 = vector.shape_cast %38 : vector<8x4xf32> to vector<1x1x8x4xf32>
      tpu.vector_store %arg6[%c0_33, %c6, %c0_34, %c0_35], %41 {strides = array<i32>} : memref<1x8x8x4xf32, #tpu.memory_space<vmem>>, vector<1x1x8x4xf32>,
      %42 = vector.extract_strided_slice %13 {offsets = [0, 28], sizes = [8, 4], strides = [1, 1]} : vector<8x32xf32> to vector<8x4xf32>
      %c0_36 = arith.constant 0 : index
      %c7 = arith.constant 7 : index
      %c0_37 = arith.constant 0 : index
      %c0_38 = arith.constant 0 : index
      %43 = vector.load %arg6[%c0_36, %c7, %c0_37, %c0_38] : memref<1x8x8x4xf32, #tpu.memory_space<vmem>>, vector<1x1x8x4xf32>
      %44 = vector.shape_cast %43 : vector<1x1x8x4xf32> to vector<8x4xf32>
      %45 = vector.shape_cast %42 : vector<8x4xf32> to vector<1x1x8x4xf32>
      tpu.vector_store %arg6[%c0_36, %c7, %c0_37, %c0_38], %45 {strides = array<i32>} : memref<1x8x8x4xf32, #tpu.memory_space<vmem>>, vector<1x1x8x4xf32>,
    } else {
    }
    return
  }
  func.func @transform_0(%arg0: i32, %arg1: i32, %arg2: i32, %arg3: i32) -> (i32, i32) {
    %c0_i32 = arith.constant 0 : i32
    return %arg2, %arg3 : i32, i32
  }
  func.func @transform_1(%arg0: i32, %arg1: i32, %arg2: i32, %arg3: i32) -> (i32, i32, i32, i32) {
    %c0_i32 = arith.constant 0 : i32
    %c0_i32_0 = arith.constant 0 : i32
    return %arg0, %arg1, %arg3, %c0_i32 : i32, i32, i32, i32
  }
  func.func @transform_2(%arg0: i32, %arg1: i32, %arg2: i32, %arg3: i32) -> (i32, i32, i32, i32) {
    %c0_i32 = arith.constant 0 : i32
    %c0_i32_0 = arith.constant 0 : i32
    return %arg0, %arg1, %arg2, %c0_i32 : i32, i32, i32, i32
  }
}

</mosaic_0001>

<bundles_post_ra>
// kernel: tpu_custom_call.1
= control target key start
LH: loop header
LB: loop body
LE: loop exit
PB: predicated region body
PF: predicated region fallthrough
CT: control target
= control target key end

     0   :  { %7 = vsyncpa [#allocation4], 0  ;;  %s897_s0 = inlined_call_operand.hbm [shape: f32[8,32], index: 0, kind: input, shape index: {}]   ;;  %s898_s1 = inlined_call_operand.hbm [shape: f32[3,1,32,32], index: 1, kind: input, shape index: {}]   ;;  %s899_s2 = inlined_call_operand.vmem [shape: f32[3,8,8,4], index: 2, kind: output, shape index: {}]  }
   0x1   :  { %8 = vsyncpa [#allocation6], 0 }
   0x2   :  { %10 = vsyncpa [#allocation6 + $0x1], 0  ;;  %s755_s9 = smov 0   ;;  %s757_s10 = smov 0  }
   0x3   :  { %s759_s11 = smov 0   ;;  %s761_s12 = smov 0  }
   0x4   :  { %s763_s13 = smov 0   ;;  %s765_s14 = smov 0  }
   0x5 LB: > { %s499_s15 = sadd.s32 4294967295, %s725_s14   ;;  %s81_s16 = sadd.s32 1, %s713_s11  ;;  %s725_s14 = sphi %s765_s14, %s16_s14   ;;  %s721_s13 = sphi %s763_s13, %s913_s13   ;;  %s717_s12 = sphi %s761_s12, %s912_s12   ;;  %s713_s11 = sphi %s759_s11, %s911_s11   ;;  %s709_s10 = sphi %s757_s10, %s910_s10   ;;  %s705_s9 = sphi %s755_s9, %s909_s9  }
   0x6   : > { %p88_p0 = scmp.ne.s32.totalorder %s713_s11, %s709_s10  ;;  %p89_p1 = scmp.eq.s32.totalorder %s725_s14, 0 }
   0x7   : > { %p94_p2 = scmp.ne.s32.totalorder %s709_s10, %s705_s9  ;;  %p789_p3 = scmp.eq.s32.totalorder %s499_s15, 0 }
   0x8   : > { %p90_p4 = por %p89_p1, %p88_p0  ;;  %p501_p5 = scmp.ge.s32.totalorder %s725_s14, 1 }
   0x9   : > { %p796_p6 = por %p789_p3, %p94_p2  ;;  %p135_p7 = scmp.lt.s32.totalorder %s725_s14, 4 }
   0xa   : > { %s727_s20 = smov [#allocation3]   ;;  %p555_p10 = scmp.lt.s32.totalorder %s725_s14, 3 }
   0xb   : > { %s903_s18 = scalar_select %p796_p6, 1, 0 }
   0xc   : > { %p801_p8 = pnand %p501_p5, %p135_p7  ;;  %s151_s21 = sshll.u32 %s727_s20, 4  ;;  %s152_s21 = int_to_ptr.vmem [resolvable:$true] %s151_s21 }
   0xd   : > { %s162_s22 = sand.u32 1, %s713_s11   ;;  %p811_p12 = pnand %p555_p10, %p90_p4 }
   0xe   : > { %s904_s19 = scalar_select %p801_p8, 1, 0 }
   0xf   : > { %p546_p9 = pneg %p801_p8  ;;  %s628_s24 = scalar_lea.vmem %s152_s21, 128 }
  0x10   : > { %p629_p0 = scmp.ne.s32.totalorder %s152_s21, %s628_s24  ;;  %p636_p5 = scmp.lt.s32.totalorder %s152_s21, %s152_s21 }
  0x11   : > { %p547_p11 = pnand %p546_p9, %p789_p3  ;;  %p637_p7 = scmp.lt.s32.totalorder %s628_s24, %s628_s24 }
  0x13   : > { %p619_p13 = pneg %p547_p11  ;;  %p638_p6 = por %p637_p7, %p636_p5 }
  0x15   : > { %p631_p1 = pnand %p629_p0, %p619_p13 }
  0x17   : > { %p632_p2 = pneg %p631_p1 }
  0x19   : > { %p639_p8 = pnand %p638_p6, %p632_p2 }
  0x1b   : > { %642 = shalt.err (!%p639_p8)
}
  0x1c   : > { %549 = dma.hbm_to_vmem [thread:$0]  (!%p547_p11), %s897_s0, 128, %s152_s21, [#allocation4]  }
  0x1d   : > { %s42_s27 = sadd.s32 1, %s721_s13  ;;  %s504_s28 = sshll.u32 %s162_s22, 5 }
  0x1e   : > { %p44_p4 = scmp.ge.s32.totalorder %s42_s27, 3  ;;  %s522_s29 = sshll.u32 %s721_s13, 9 }
  0x1f   : > { %s166_s30 = scalar_lea.vmem [#allocation5], %s504_s28  ;;  %s176_s6 = scalar_lea.hbm %s898_s1, %s522_s29 }
  0x20   : > { %s177_s3 = sshll.u32 %s166_s30, 4  ;;  %s915_s27 = smov (%p44_p4, %s42_s27), 0  ;;  %s178_s3 = int_to_ptr.vmem [resolvable:$true] %s177_s3 }
  0x21   : > { %s74_s7 = ssub.s32 %s721_s13, %s915_s27  ;;  %s163_s9 = scalar_lea.sflag [#allocation6], %s162_s22 }
  0x22   : > { %p827_p6 = scmp.eq.s32.totalorder %s74_s7, 0  ;;  %p645_p8 = pneg %p811_p12 }
  0x23   : > { %s656_s15 = scalar_lea.vmem %s178_s3, 512  ;;  %s728_s20 = smov [#allocation5]  }
  0x24   : > { %p657_p9 = scmp.ne.s32.totalorder %s178_s3, %s656_s15  ;;  %s661_s21 = sshll.u32 %s728_s20, 4  ;;  %s662_s21 = int_to_ptr.vmem [resolvable:$false] %s661_s21 }
  0x25   : > { %s663_s24 = scalar_lea.vmem %s662_s21, 1024  ;;  %p664_p13 = scmp.lt.s32.totalorder %s178_s3, %s662_s21 }
  0x26   : > { %p659_p10 = pnand %p657_p9, %p645_p8  ;;  %p665_p0 = scmp.lt.s32.totalorder %s663_s24, %s656_s15 }
  0x28   : > { %p660_p11 = pneg %p659_p10  ;;  %p666_p1 = por %p665_p0, %p664_p13 }
  0x2a   : > { %p667_p2 = pnand %p666_p1, %p660_p11 }
  0x2c   : > { %670 = shalt.err (!%p667_p2)
}
  0x2d   : > { %s729_s25 = smov 128   ;;  %s730_s22 = smov 8  }
  0x2e   : > { %553 = dma.hbm_to_vmem [thread:$0]  (!%p811_p12), %s176_s6, 512, %s178_s3, %s163_s9, %s729_s25, %s729_s25, %s730_s22  }
  0x2f   : > { %s840_s26 = scalar_select %p827_p6, %s713_s11, %s81_s16  }
  0x30   : > { %p907_p5 = scmp.ne.s32.totalorder %s904_s19, 0 }
  0x32   : > { %189 = sbr.rel (%p907_p5) target bundleno = 400 (0x190), region = 28 }
  0x37   : > { %696 = dma.done.wait (%p789_p3), [#allocation4], 128  }
  0x38   : > { %698 = vsyncadd (%p789_p3), [#allocation4], 4294967168  ;;  %s195_s28 = sand.u32 1, %s709_s10   ;;  %p908_p12 = scmp.ne.s32.totalorder %s903_s18, 0 }
  0x39   : > { %s509_s29 = sshll.u32 %s195_s28, 5  ;;  %s196_s30 = scalar_lea.sflag [#allocation6], %s195_s28 }
  0x3a   : > { %s199_s23 = scalar_lea.vmem [#allocation5], %s509_s29 }
  0x3b   : > { %700 = dma.done.wait (%p908_p12), %s196_s30, 512  }
  0x3c   : > { %702 = vsyncadd (%p908_p12), %s196_s30, 4294966784  ;;  %vm245_vm0 = vcmask 261120   ;;  %v731_v0 = vmov 0.0   ;;  %vm732_vm1 = vmmov 0   ;;  %v252_v1 = vld [vmem:[%s199_s23 + $0x18] sm:$0xff]  ;;  %v251_v2 = vld [vmem:[%s199_s23 + $0x10] sm:$0xff] }
  0x3d   : > { %529 = vmatprep.subr.mxu0 %v731_v0  ;;  %537 = vmatprep.mubr.msk.f32.mxu0 %vm732_vm1, %v731_v0  ;;  %246 = vst.msk [vmem:[#allocation2] sm:$0xff] %vm245_vm0, %v731_v0  ;;  %v250_v3 = vld [vmem:[%s199_s23 + $0x8] sm:$0xff]  ;;  %v249_v4 = vld [vmem:[%s199_s23] sm:$0xff]  ;;  %v248_v5 = vld [vmem:[#allocation3] sm:$0xff]  ;;  %p229_p3 = scmp.lt.s32.totalorder %s717_s12, 2  ;;  %vm333_vm2 = vcmask 31744  }
  0x3e   : > { %530 = vmatpush3.msra.mxu0 %v252_v1  ;;  %s733_s3 = smov 116   ;;  %s734_s4 = smov 124  }
  0x3f   : > { %531 = vmatprep.subr.mxu0 %v731_v0  ;;  %s917_s12 = smov (!%p229_p3, %s717_s12), 2  ;;  %s735_s5 = smov 112  }
  0x40   : > { %532 = vmatpush3.msra.mxu0 %v251_v2  ;;  %s523_s16 = sshll.u32 %s917_s12, 6  ;;  %s736_s12 = smov 120  }
  0x41   : > { %533 = vmatprep.subr.mxu0 %v731_v0  ;;  %s861_s19 = scalar_lea.vmem %s899_s2, %s523_s16  ;;  %s737_s6 = smov 104  }
  0x42   : > { %534 = vmatpush3.msra.mxu0 %v250_v3  ;;  %s738_s7 = smov 108   ;;  %s739_s8 = smov 100  }
  0x43   : > { %535 = vmatprep.subr.mxu0 %v731_v0 }
  0x44   : > { %536 = vmatpush3.msra.mxu0 %v249_v4  ;;  %v247_v6 = vld [vmem:[#allocation2] sm:$0xff] }
  0x45   : > { %538 = vmatmul.mubr.msk.f32.vlgmr.msra.gmra.mxu0 %vm245_vm0, %v248_v5 }
 0x105   : > { %v323_v7 = vpop.f32.mrf.mxu0 }
 0x106   : > { %v327_v8 = vadd.f32 %v323_v7, %v247_v6 }
 0x107   : > { %v539_v9 = vpop.f32.mrf.mxu0 }
 0x108   : > { %328 = vst.msk [vmem:[#allocation2] sm:$0xff] %vm245_vm0, %v327_v8 }
 0x10f   : > { %v332_v10 = vld [vmem:[#allocation2] sm:$0xff] }
 0x110   : > { %346 = vrot.lane.b32.xlu1 %v332_v10, %s733_s3  ;;  %336 = vrot.lane.b32.xlu0 %v332_v10, %s734_s4  ;;  %334 = vst.msk [vmem:[%s861_s19] sm:$0xff] %vm333_vm2, %v332_v10 }
 0x114   : > { %351 = vrot.lane.b32.xlu1 %v332_v10, %s735_s5  ;;  %341 = vrot.lane.b32.xlu0 %v332_v10, %s736_s12 }
 0x118   : > { %361 = vrot.lane.b32.xlu1 %v332_v10, %s737_s6  ;;  %356 = vrot.lane.b32.xlu0 %v332_v10, %s738_s7 }
 0x11c   : > { %366 = vrot.lane.b32.xlu0 %v332_v10, %s739_s8 }
 0x182   : > { %v347_v11 = vpop.permute.xlu1 %346  ;;  %v337_v12 = vpop.permute.xlu0 %336 }
 0x183   : > { %515 = vst.msk [vmem:[%s861_s19 + $0x18] sm:$0xff] %vm333_vm2, %v347_v11  ;;  %513 = vst.msk [vmem:[%s861_s19 + $0x8] sm:$0xff] %vm333_vm2, %v337_v12 }
 0x186   : > { %v352_v13 = vpop.permute.xlu1 %351  ;;  %v342_v14 = vpop.permute.xlu0 %341 }
 0x187   : > { %516 = vst.msk [vmem:[%s861_s19 + $0x20] sm:$0xff] %vm333_vm2, %v352_v13  ;;  %514 = vst.msk [vmem:[%s861_s19 + $0x10] sm:$0xff] %vm333_vm2, %v342_v14 }
 0x18a   : > { %v362_v15 = vpop.permute.xlu1 %361  ;;  %v357_v16 = vpop.permute.xlu0 %356 }
 0x18b   : > { %518 = vst.msk [vmem:[%s861_s19 + $0x30] sm:$0xff] %vm333_vm2, %v362_v15  ;;  %517 = vst.msk [vmem:[%s861_s19 + $0x28] sm:$0xff] %vm333_vm2, %v357_v16 }
 0x18e   : > { %v367_v17 = vpop.permute.xlu0 %366 }
 0x18f   : > { %519 = vst.msk [vmem:[%s861_s19 + $0x38] sm:$0xff] %vm333_vm2, %v367_v17 }
 0x190 PF: > { %s16_s14 = sadd.s32 1, %s725_s14   ;;  %s909_s9 = smov %s709_s10 }
 0x191   : > { %p13_p7 = scmp.ge.s32.totalorder %s16_s14, 5   ;;  %s910_s10 = smov %s713_s11 }
 0x192   : > { %s911_s11 = smov %s840_s26  ;;  %s912_s12 = smov %s721_s13 }
 0x193   : > { %s913_s13 = smov %s915_s27  ;;  %15 = sbr.rel (!%p13_p7) target bundleno = 5 (0x5), region = 89 }
 0x198   :  { %407 = vsyncpa [#allocation4], 1 }
 0x199   :  { %409 = vsyncpa [#allocation4 + $0x1], 1 }
 0x19a   :  { %410 = vsyncpa [#allocation6], 1 }
 0x19b   :  { %412 = vsyncpa [#allocation6 + $0x1], 1 }

</bundles_post_ra>
